<compile_context>
chip_gen: v6e
topology: v6e:2x2x1
jax: 0.10.0
libtpu: 0.0.40
codegen_flags: <defaults>
</compile_context>

<pallas_src>
import jax
import jax.numpy as jnp
from jax.experimental import pallas as pl
from jax.experimental.pallas import tpu as pltpu


def mlp_kernel(x_ref, w1_ref, b1_ref, w2_ref, b2_ref, w3_ref, b3_ref, o_ref):
    # Cast the f32 activation tile to bf16 in-kernel (no wrapper HBM pass).
    x = x_ref[...].astype(jnp.bfloat16)
    # Layer 1: (TM,784)bf16 @ (784,256)bf16 -> f32 acc, bias + ReLU in f32.
    h1 = jnp.dot(x, w1_ref[...], preferred_element_type=jnp.float32)
    h1 = jnp.maximum(h1 + b1_ref[...], 0.0)
    # Layer 2: (TM,256) @ (256,256)
    h2 = jnp.dot(h1.astype(jnp.bfloat16), w2_ref[...],
                 preferred_element_type=jnp.float32)
    h2 = jnp.maximum(h2 + b2_ref[...], 0.0)
    # Layer 3: (TM,256) @ (256,128)  (128 = 10 real outputs + 118 zero pad)
    out = jnp.dot(h2.astype(jnp.bfloat16), w3_ref[...],
                  preferred_element_type=jnp.float32)
    o_ref[...] = (out + b3_ref[...]).astype(o_ref.dtype)


def _round_up(n, m):
    return ((n + m - 1) // m) * m


def _choose_tile(B, block_m):
    """Pick (tm, Bp): tm multiple of 8 (f32 sublanes), capped at block_m,
    and yielding >= 2 grid steps whenever the batch allows it (v7x dual-TC)."""
    Bp8 = _round_up(B, 8)
    if Bp8 <= 8:
        return Bp8, Bp8                      # single minimal tile
    half = _round_up((Bp8 + 1) // 2, 8)      # target >= 2 grid steps
    tm = min(block_m, half)
    Bp = _round_up(B, tm)
    return tm, Bp


def mlp_forward(x, params, *, block_m=1024):
    """x: (B, ...) flattened to (B, 784) float32. Returns (B, 10) float32."""
    w1, b1, w2, b2, w3, b3 = params  # w3/b3 already zero-padded to 128 lanes
    B = x.shape[0]
    x2d = x.reshape(B, 784)          # stays f32; bf16 cast happens in-kernel

    tm, Bp = _choose_tile(B, block_m)
    if Bp != B:
        x2d = jnp.pad(x2d, ((0, Bp - B), (0, 0)))

    n_out_pad = w3.shape[1]  # 128 (lane-dense padded output)

    # Weights/biases: same block for every grid step -> resident in VMEM.
    resident = lambda a: pl.BlockSpec(a.shape, lambda i: (0,) * a.ndim)

    out = pl.pallas_call(
        mlp_kernel,
        out_shape=jax.ShapeDtypeStruct((Bp, n_out_pad), jnp.float32),
        grid=(Bp // tm,),
        in_specs=[
            pl.BlockSpec((tm, 784), lambda i: (i, 0)),   # f32 activation tile
            resident(w1), resident(b1),
            resident(w2), resident(b2),
            resident(w3), resident(b3),
        ],
        out_specs=pl.BlockSpec((tm, n_out_pad), lambda i: (i, 0)),
        compiler_params=pltpu.CompilerParams(
            dimension_semantics=("parallel",),   # shard batch over 2 TCs on v7x
            vmem_limit_bytes=32 << 20,           # headroom for tm up to ~2048
        ),
    )(x2d, w1, b1, w2, b2, w3, b3)
    return out[:B, :10]


def init_params(key):
    """Mirror nn.Linear init; weights stored (in, out) in bf16, biases f32.

    The final layer is zero-padded from 10 to 128 output features so the
    kernel's output tile is lane-dense (unmasked stores)."""
    k1, k2, k3, k4, k5, k6 = jax.random.split(key, 6)

    def linear(kw, kb, fan_in, fan_out):
        bound = 1.0 / jnp.sqrt(fan_in)
        w = jax.random.uniform(kw, (fan_in, fan_out), jnp.float32, -bound, bound)
        b = jax.random.uniform(kb, (1, fan_out), jnp.float32, -bound, bound)
        return w, b

    w1, b1 = linear(k1, k2, 784, 256)
    w2, b2 = linear(k3, k4, 256, 256)
    w3, b3 = linear(k5, k6, 256, 10)

    # Lane-dense pad of the last layer: 10 -> 128 output features (zeros).
    w3p = jnp.pad(w3, ((0, 0), (0, 128 - 10)))
    b3p = jnp.pad(b3, ((0, 0), (0, 128 - 10)))

    return (w1.astype(jnp.bfloat16), b1,
            w2.astype(jnp.bfloat16), b2,
            w3p.astype(jnp.bfloat16), b3p)


def mlp_reference(x, params):
    """Pure-JAX reference with the same bf16-in / f32-accumulate numerics."""
    # TODO(synk): bf16 MXU inputs diverge bit-wise from the f32 PyTorch MLP;
    # reference matches the kernel's numerics intentionally.
    w1, b1, w2, b2, w3, b3 = params
    x = x.reshape(x.shape[0], 784).astype(jnp.bfloat16)
    h1 = jnp.maximum(
        jnp.dot(x, w1, preferred_element_type=jnp.float32) + b1, 0.0)
    h2 = jnp.maximum(
        jnp.dot(h1.astype(jnp.bfloat16), w2,
                preferred_element_type=jnp.float32) + b2, 0.0)
    out = jnp.dot(h2.astype(jnp.bfloat16), w3,
                  preferred_element_type=jnp.float32) + b3
    return out[:, :10]


if __name__ == "__main__":
    key = jax.random.PRNGKey(0)
    kx, kp = jax.random.split(key)

    # MNIST-like NCHW input: batch=8, 1 channel, 28x28 -> flattened to 784.
    x = jax.random.normal(kx, (8, 1, 28, 28), jnp.float32)
    params = init_params(kp)

    out = mlp_forward(x, params)
    out = jax.block_until_ready(out)

    ref = mlp_reference(x, params)
    assert out.shape == (8, 10)
    # bf16 MXU inputs -> compare against the bf16-matched reference.
    assert jnp.allclose(out, ref, atol=2e-3, rtol=2e-3)

    print("KERNEL_OK")
</pallas_src>

<mosaic_0001>
module attributes {stable_mosaic.version = 11 : i64} {
  func.func @mlp_kernel(%arg0: i32, %arg1: memref<8x784xf32, #tpu.memory_space<vmem>>, %arg2: memref<784x256xbf16, #tpu.memory_space<vmem>>, %arg3: memref<1x256xf32, #tpu.memory_space<vmem>>, %arg4: memref<256x256xbf16, #tpu.memory_space<vmem>>, %arg5: memref<1x256xf32, #tpu.memory_space<vmem>>, %arg6: memref<256x128xbf16, #tpu.memory_space<vmem>>, %arg7: memref<1x128xf32, #tpu.memory_space<vmem>>, %arg8: memref<8x128xf32, #tpu.memory_space<vmem>>) attributes {dimension_semantics = [#tpu.dimension_semantics<parallel>], iteration_bounds = array<i64: 1>, scalar_prefetch = 0 : i64, scratch_operands = 0 : i64, tpu.core_type = #tpu.core_type<tc>, window_params = [{transform_indices = @transform_0, window_bounds = array<i64: 8, 784>}, {pipeline_mode = #tpu.pipeline_mode<synchronous>, transform_indices = @transform_1, window_bounds = array<i64: 784, 256>}, {pipeline_mode = #tpu.pipeline_mode<synchronous>, transform_indices = @transform_2, window_bounds = array<i64: 1, 256>}, {pipeline_mode = #tpu.pipeline_mode<synchronous>, transform_indices = @transform_3, window_bounds = array<i64: 256, 256>}, {pipeline_mode = #tpu.pipeline_mode<synchronous>, transform_indices = @transform_4, window_bounds = array<i64: 1, 256>}, {pipeline_mode = #tpu.pipeline_mode<synchronous>, transform_indices = @transform_5, window_bounds = array<i64: 256, 128>}, {pipeline_mode = #tpu.pipeline_mode<synchronous>, transform_indices = @transform_6, window_bounds = array<i64: 1, 128>}, {transform_indices = @transform_7, window_bounds = array<i64: 8, 128>}]} {
    %c0 = arith.constant 0 : index
    %c0_0 = arith.constant 0 : index
    %0 = vector.load %arg1[%c0, %c0_0] : memref<8x784xf32, #tpu.memory_space<vmem>>, vector<8x784xf32>
    %1 = arith.truncf %0 : vector<8x784xf32> to vector<8x784xbf16>
    %c0_1 = arith.constant 0 : index
    %c0_2 = arith.constant 0 : index
    %2 = vector.load %arg2[%c0_1, %c0_2] : memref<784x256xbf16, #tpu.memory_space<vmem>>, vector<784x256xbf16>
    %cst = arith.constant dense<0.000000e+00> : vector<8x256xf32>
    %3 = tpu.matmul %1, %2, %cst {dimension_numbers = #tpu.dot_dimension_numbers<[1], [0], [0], [1], [0, 0, 1, 1], [], []>} : vector<8x784xbf16>, vector<784x256xbf16>, vector<8x256xf32> -> vector<8x256xf32>
    %c0_3 = arith.constant 0 : index
    %c0_4 = arith.constant 0 : index
    %4 = vector.load %arg3[%c0_3, %c0_4] : memref<1x256xf32, #tpu.memory_space<vmem>>, vector<1x256xf32>
    %5 = vector.broadcast %4 : vector<1x256xf32> to vector<8x256xf32>
    %6 = arith.addf %3, %5 : vector<8x256xf32>
    %cst_5 = arith.constant 0.000000e+00 : f32
    %7 = vector.broadcast %cst_5 : f32 to vector<8x256xf32>
    %8 = arith.maximumf %6, %7 : vector<8x256xf32>
    %9 = arith.truncf %8 : vector<8x256xf32> to vector<8x256xbf16>
    %c0_6 = arith.constant 0 : index
    %c0_7 = arith.constant 0 : index
    %10 = vector.load %arg4[%c0_6, %c0_7] : memref<256x256xbf16, #tpu.memory_space<vmem>>, vector<256x256xbf16>
    %cst_8 = arith.constant dense<0.000000e+00> : vector<8x256xf32>
    %11 = tpu.matmul %9, %10, %cst_8 {dimension_numbers = #tpu.dot_dimension_numbers<[1], [0], [0], [1], [0, 0, 1, 1], [], []>} : vector<8x256xbf16>, vector<256x256xbf16>, vector<8x256xf32> -> vector<8x256xf32>
    %c0_9 = arith.constant 0 : index
    %c0_10 = arith.constant 0 : index
    %12 = vector.load %arg5[%c0_9, %c0_10] : memref<1x256xf32, #tpu.memory_space<vmem>>, vector<1x256xf32>
    %13 = vector.broadcast %12 : vector<1x256xf32> to vector<8x256xf32>
    %14 = arith.addf %11, %13 : vector<8x256xf32>
    %cst_11 = arith.constant 0.000000e+00 : f32
    %15 = vector.broadcast %cst_11 : f32 to vector<8x256xf32>
    %16 = arith.maximumf %14, %15 : vector<8x256xf32>
    %17 = arith.truncf %16 : vector<8x256xf32> to vector<8x256xbf16>
    %c0_12 = arith.constant 0 : index
    %c0_13 = arith.constant 0 : index
    %18 = vector.load %arg6[%c0_12, %c0_13] : memref<256x128xbf16, #tpu.memory_space<vmem>>, vector<256x128xbf16>
    %cst_14 = arith.constant dense<0.000000e+00> : vector<8x128xf32>
    %19 = tpu.matmul %17, %18, %cst_14 {dimension_numbers = #tpu.dot_dimension_numbers<[1], [0], [0], [1], [0, 0, 1, 1], [], []>} : vector<8x256xbf16>, vector<256x128xbf16>, vector<8x128xf32> -> vector<8x128xf32>
    %c0_15 = arith.constant 0 : index
    %c0_16 = arith.constant 0 : index
    %20 = vector.load %arg7[%c0_15, %c0_16] : memref<1x128xf32, #tpu.memory_space<vmem>>, vector<1x128xf32>
    %21 = vector.broadcast %20 : vector<1x128xf32> to vector<8x128xf32>
    %22 = arith.addf %19, %21 : vector<8x128xf32>
    %c0_17 = arith.constant 0 : index
    %c0_18 = arith.constant 0 : index
    %23 = vector.load %arg8[%c0_17, %c0_18] : memref<8x128xf32, #tpu.memory_space<vmem>>, vector<8x128xf32>
    tpu.vector_store %arg8[%c0_17, %c0_18], %22 {strides = array<i32>} : memref<8x128xf32, #tpu.memory_space<vmem>>, vector<8x128xf32>,
    return
  }
  func.func @transform_0(%arg0: i32) -> (i32, i32) {
    %c0_i32 = arith.constant 0 : i32
    %c0_i32_0 = arith.constant 0 : i32
    return %arg0, %c0_i32 : i32, i32
  }
  func.func @transform_1(%arg0: i32) -> (i32, i32) {
    %c0_i32 = arith.constant 0 : i32
    %c0_i32_0 = arith.constant 0 : i32
    %c0_i32_1 = arith.constant 0 : i32
    return %c0_i32, %c0_i32_0 : i32, i32
  }
  func.func @transform_2(%arg0: i32) -> (i32, i32) {
    %c0_i32 = arith.constant 0 : i32
    %c0_i32_0 = arith.constant 0 : i32
    %c0_i32_1 = arith.constant 0 : i32
    return %c0_i32, %c0_i32_0 : i32, i32
  }
  func.func @transform_3(%arg0: i32) -> (i32, i32) {
    %c0_i32 = arith.constant 0 : i32
    %c0_i32_0 = arith.constant 0 : i32
    %c0_i32_1 = arith.constant 0 : i32
    return %c0_i32, %c0_i32_0 : i32, i32
  }
  func.func @transform_4(%arg0: i32) -> (i32, i32) {
    %c0_i32 = arith.constant 0 : i32
    %c0_i32_0 = arith.constant 0 : i32
    %c0_i32_1 = arith.constant 0 : i32
    return %c0_i32, %c0_i32_0 : i32, i32
  }
  func.func @transform_5(%arg0: i32) -> (i32, i32) {
    %c0_i32 = arith.constant 0 : i32
    %c0_i32_0 = arith.constant 0 : i32
    %c0_i32_1 = arith.constant 0 : i32
    return %c0_i32, %c0_i32_0 : i32, i32
  }
  func.func @transform_6(%arg0: i32) -> (i32, i32) {
    %c0_i32 = arith.constant 0 : i32
    %c0_i32_0 = arith.constant 0 : i32
    %c0_i32_1 = arith.constant 0 : i32
    return %c0_i32, %c0_i32_0 : i32, i32
  }
  func.func @transform_7(%arg0: i32) -> (i32, i32) {
    %c0_i32 = arith.constant 0 : i32
    %c0_i32_0 = arith.constant 0 : i32
    return %arg0, %c0_i32 : i32, i32
  }
}

</mosaic_0001>

<bundles_post_ra>
// kernel: tpu_custom_call.1
= control target key start
LH: loop header
LB: loop body
LE: loop exit
PB: predicated region body
PF: predicated region fallthrough
CT: control target
= control target key end

     0   :  { %12 = vsyncpa [#allocation3], 0  ;;  %s1882_s0 = inlined_call_operand.hbm [shape: f32[8,784], index: 0, kind: input, shape index: {}]   ;;  %s1883_s1 = inlined_call_operand.hbm [shape: bf16[784,256], index: 1, kind: input, shape index: {}]   ;;  %s1884_s2 = inlined_call_operand.vmem [shape: f32[1,256], index: 2, kind: input, shape index: {}]   ;;  %s1885_s3 = inlined_call_operand.hbm [shape: bf16[256,256], index: 3, kind: input, shape index: {}]   ;;  %s1886_s4 = inlined_call_operand.vmem [shape: f32[1,256], index: 4, kind: input, shape index: {}]   ;;  %s1887_s5 = inlined_call_operand.hbm [shape: bf16[256,128], index: 5, kind: input, shape index: {}]   ;;  %s1888_s6 = inlined_call_operand.vmem [shape: f32[1,128], index: 6, kind: input, shape index: {}]   ;;  %s1889_s7 = inlined_call_operand.hbm [shape: f32[8,128], index: 7, kind: output, shape index: {}]  }
   0x1   :  { %13 = vsyncpa [#allocation6], 0 }
   0x2   :  { %14 = vsyncpa [#allocation9], 0 }
   0x3   :  { %15 = vsyncpa [#allocation4], 0  ;;  %s1808_s24 = smov [#allocation5]  }
   0x4   :  { %s31_s25 = sshll.u32 %s1808_s24, 4  ;;  %s32_s25 = int_to_ptr.vmem [resolvable:$true] %s31_s25 }
   0x5   :  { %s1708_s26 = scalar_lea.vmem %s32_s25, 12544  ;;  %p1713_p1 = scmp.lt.s32.totalorder %s32_s25, %s32_s25 }
   0x6   :  { %p1709_p0 = scmp.ne.s32.totalorder %s32_s25, %s1708_s26  ;;  %p1714_p2 = scmp.lt.s32.totalorder %s1708_s26, %s1708_s26 }
   0x8   :  { %p1715_p3 = por %p1714_p2, %p1713_p1 }
   0xa   :  { %p1716_p4 = pnand %p1715_p3, %p1709_p0 }
   0xc   :  { %1719 = shalt.err (!%p1716_p4)
}
   0xd   :  { %s1809_s27 = smov 128   ;;  %s1810_s28 = smov 8  }
   0xe   :  { %37 = dma.hbm_to_vmem [thread:$0]  %s1883_s1, 12544, %s32_s25, [#allocation6], %s1809_s27, %s1809_s27, %s1810_s28  }
   0xf   :  { %s1811_s8 = smov [#allocation2]   ;;  %s1812_s10 = smov [#allocation7]  }
  0x10   :  { %s22_s9 = sshll.u32 %s1811_s8, 4  ;;  %s45_s11 = sshll.u32 %s1812_s10, 4  ;;  %s23_s9 = int_to_ptr.vmem [resolvable:$true] %s22_s9  ;;  %s46_s11 = int_to_ptr.vmem [resolvable:$true] %s45_s11 }
  0x11   :  { %s1728_s12 = scalar_lea.vmem %s23_s9, 896  ;;  %p1733_p6 = scmp.lt.s32.totalorder %s23_s9, %s23_s9 }
  0x12   :  { %p1729_p5 = scmp.ne.s32.totalorder %s23_s9, %s1728_s12  ;;  %p1734_p7 = scmp.lt.s32.totalorder %s1728_s12, %s1728_s12 }
  0x14   :  { %p1735_p8 = por %p1734_p7, %p1733_p6 }
  0x16   :  { %p1736_p9 = pnand %p1735_p8, %p1729_p5 }
  0x18   :  { %1739 = shalt.err (!%p1736_p9)
}
  0x19   :  { %25 = dma.hbm_to_vmem [thread:$0]  %s1882_s0, 896, %s23_s9, [#allocation3]  }
  0x1a   :  { %s1748_s15 = scalar_lea.vmem %s46_s11, 4096  ;;  %p1753_p11 = scmp.lt.s32.totalorder %s46_s11, %s46_s11 }
  0x1b   :  { %p1749_p10 = scmp.ne.s32.totalorder %s46_s11, %s1748_s15  ;;  %p1754_p12 = scmp.lt.s32.totalorder %s1748_s15, %s1748_s15 }
  0x1d   :  { %p1755_p13 = por %p1754_p12, %p1753_p11 }
  0x1f   :  { %p1756_p0 = pnand %p1755_p13, %p1749_p10 }
  0x21   :  { %1759 = shalt.err (!%p1756_p0)
}
  0x22   :  { %51 = dma.hbm_to_vmem [thread:$0]  %s1885_s3, 4096, %s46_s11, [#allocation6], %s1809_s27, %s1809_s27, %s1810_s28  }
  0x23   :  { %s1813_s17 = smov [#allocation8]  }
  0x24   :  { %s59_s18 = sshll.u32 %s1813_s17, 4  ;;  %s60_s18 = int_to_ptr.vmem [resolvable:$true] %s59_s18 }
  0x25   :  { %s1768_s19 = scalar_lea.vmem %s60_s18, 2048  ;;  %p1773_p2 = scmp.lt.s32.totalorder %s60_s18, %s60_s18 }
  0x26   :  { %p1769_p1 = scmp.ne.s32.totalorder %s60_s18, %s1768_s19  ;;  %p1774_p3 = scmp.lt.s32.totalorder %s1768_s19, %s1768_s19 }
  0x28   :  { %p1775_p4 = por %p1774_p3, %p1773_p2 }
  0x2a   :  { %p1776_p5 = pnand %p1775_p4, %p1769_p1 }
  0x2c   :  { %1779 = shalt.err (!%p1776_p5)
}
  0x2d   :  { %s1814_s0 = smov 64   ;;  %s1815_s20 = smov 4  }
  0x2e   :  { %65 = dma.hbm_to_vmem [thread:$0]  %s1887_s5, 2048, %s60_s18, [#allocation9], %s1814_s0, %s1814_s0, %s1815_s20  }
  0x2f   :  { %1800 = dma.done.wait [#allocation3], 896  }
  0x30   :  { %1801 = vsyncadd [#allocation3], 4294966400 }
  0x31   :  { %1802 = dma.done.wait [#allocation6], 16640  }
  0x32   :  { %1803 = vsyncadd [#allocation6], 4294950656 }
  0x33   :  { %1804 = dma.done.wait [#allocation9], 2048  }
  0x34   :  { %1805 = vsyncadd [#allocation9], 4294965248  ;;  %v1489_v0 = vld [vmem:[#allocation5 + $0x74] ss:$8 sps:$4 sm:$0xff]   ;;  %v1491_v1 = vld [vmem:[#allocation5 + $0x70] ss:$8 sps:$4 sm:$0xff]  }
  0x35   :  { %699 = vmatprep.subr.bf16.mxu0 %v1489_v0  ;;  %v1492_v2 = vld [vmem:[#allocation5 + $0x174] ss:$8 sps:$4 sm:$0xff]   ;;  %v1494_v3 = vld [vmem:[#allocation5 + $0x170] ss:$8 sps:$4 sm:$0xff]   ;;  %v1495_v4 = vld [vmem:[#allocation5 + $0x64] ss:$8 sps:$4 sm:$0xff]  }
  0x36   :  { %700 = vmatpush1.bf16.msra.mxu0 %v1491_v1  ;;  %v1497_v5 = vld [vmem:[#allocation5 + $0x60] ss:$8 sps:$4 sm:$0xff]   ;;  %740 = vmatprep.subr.bf16.mxu1 %v1492_v2  ;;  %v1498_v6 = vld [vmem:[#allocation5 + $0x164] ss:$8 sps:$4 sm:$0xff]   ;;  %v1501_v8 = vld [vmem:[#allocation5 + $0x54] ss:$8 sps:$4 sm:$0xff]  }
  0x37   :  { %741 = vmatpush1.bf16.msra.mxu1 %v1494_v3  ;;  %701 = vmatprep.subr.bf16.mxu0 %v1495_v4  ;;  %v1500_v7 = vld [vmem:[#allocation5 + $0x160] ss:$8 sps:$4 sm:$0xff]   ;;  %v1503_v9 = vld [vmem:[#allocation5 + $0x50] ss:$8 sps:$4 sm:$0xff]   ;;  %v1504_v10 = vld [vmem:[#allocation5 + $0x154] ss:$8 sps:$4 sm:$0xff]  }
  0x38   :  { %742 = vmatprep.subr.bf16.mxu1 %v1498_v6  ;;  %v1507_v11 = vld [vmem:[#allocation5 + $0x44] ss:$8 sps:$4 sm:$0xff]   ;;  %v1506_v12 = vld [vmem:[#allocation5 + $0x150] ss:$8 sps:$4 sm:$0xff]   ;;  %v1509_v14 = vld [vmem:[#allocation5 + $0x40] ss:$8 sps:$4 sm:$0xff]  }
  0x39   :  { %v1510_v13 = vld [vmem:[#allocation5 + $0x144] ss:$8 sps:$4 sm:$0xff]   ;;  %v1513_v15 = vld [vmem:[#allocation5 + $0x34] ss:$8 sps:$4 sm:$0xff]   ;;  %v1512_v16 = vld [vmem:[#allocation5 + $0x140] ss:$8 sps:$4 sm:$0xff]  }
  0x3a   :  { %702 = vmatpush1.bf16.msra.mxu0 %v1497_v5  ;;  %v1516_v17 = vld [vmem:[#allocation5 + $0x134] ss:$8 sps:$4 sm:$0xff]   ;;  %v1515_v18 = vld [vmem:[#allocation5 + $0x30] ss:$8 sps:$4 sm:$0xff]   ;;  %v1519_v19 = vld [vmem:[#allocation5 + $0x24] ss:$8 sps:$4 sm:$0xff]  }
  0x3b   :  { %703 = vmatprep.subr.bf16.mxu0 %v1501_v8  ;;  %743 = vmatpush1.bf16.msra.mxu1 %v1500_v7  ;;  %v1518_v20 = vld [vmem:[#allocation5 + $0x130] ss:$8 sps:$4 sm:$0xff]   ;;  %v1522_v21 = vld [vmem:[#allocation5 + $0x124] ss:$8 sps:$4 sm:$0xff]   ;;  %v1521_v22 = vld [vmem:[#allocation5 + $0x20] ss:$8 sps:$4 sm:$0xff]  }
  0x3c   :  { %744 = vmatprep.subr.bf16.mxu1 %v1504_v10  ;;  %v1525_v23 = vld [vmem:[#allocation5 + $0x14] ss:$8 sps:$4 sm:$0xff]   ;;  %v1524_v24 = vld [vmem:[#allocation5 + $0x120] ss:$8 sps:$4 sm:$0xff]   ;;  %v1527_v26 = vld [vmem:[#allocation5 + $0x10] ss:$8 sps:$4 sm:$0xff]  }
  0x3d   :  { %v1528_v25 = vld [vmem:[#allocation5 + $0x114] ss:$8 sps:$4 sm:$0xff]   ;;  %v1531_v27 = vld [vmem:[#allocation5 + $0x4] ss:$8 sps:$4 sm:$0xff]   ;;  %v1530_v28 = vld [vmem:[#allocation5 + $0x110] ss:$8 sps:$4 sm:$0xff]  }
  0x3e   :  { %704 = vmatpush1.bf16.msra.mxu0 %v1503_v9  ;;  %v1534_v29 = vld [vmem:[#allocation5 + $0x104] ss:$8 sps:$4 sm:$0xff]   ;;  %v1533_v30 = vld [vmem:[#allocation5] ss:$8 sps:$4 sm:$0xff]   ;;  %v1537_v31 = vld [vmem:[#allocation5 + $0xf4] ss:$8 sps:$4 sm:$0xff]  }
  0x3f   :  { %705 = vmatprep.subr.bf16.mxu0 %v1507_v11  ;;  %745 = vmatpush1.bf16.msra.mxu1 %v1506_v12  ;;  %v1536_v32 = vld [vmem:[#allocation5 + $0x100] ss:$8 sps:$4 sm:$0xff]   ;;  %v1540_v33 = vld [vmem:[#allocation5 + $0x1f4] ss:$8 sps:$4 sm:$0xff]   ;;  %v1539_v34 = vld [vmem:[#allocation5 + $0xf0] ss:$8 sps:$4 sm:$0xff]  }
  0x40   :  { %746 = vmatprep.subr.bf16.mxu1 %v1510_v13  ;;  %v1543_v35 = vld [vmem:[#allocation5 + $0xe4] ss:$8 sps:$4 sm:$0xff]   ;;  %v1542_v36 = vld [vmem:[#allocation5 + $0x1f0] ss:$8 sps:$4 sm:$0xff]   ;;  %v1545_v38 = vld [vmem:[#allocation5 + $0xe0] ss:$8 sps:$4 sm:$0xff]  }
  0x41   :  { %v1546_v37 = vld [vmem:[#allocation5 + $0x1e4] ss:$8 sps:$4 sm:$0xff]   ;;  %v1549_v39 = vld [vmem:[#allocation5 + $0xd4] ss:$8 sps:$4 sm:$0xff]   ;;  %v1548_v40 = vld [vmem:[#allocation5 + $0x1e0] ss:$8 sps:$4 sm:$0xff]  }
  0x42   :  { %706 = vmatpush1.bf16.msra.mxu0 %v1509_v14  ;;  %v1552_v41 = vld [vmem:[#allocation5 + $0x1d4] ss:$8 sps:$4 sm:$0xff]   ;;  %v1551_v42 = vld [vmem:[#allocation5 + $0xd0] ss:$8 sps:$4 sm:$0xff]   ;;  %v1555_v43 = vld [vmem:[#allocation5 + $0xc4] ss:$8 sps:$4 sm:$0xff]  }
  0x43   :  { %707 = vmatprep.subr.bf16.mxu0 %v1513_v15  ;;  %747 = vmatpush1.bf16.msra.mxu1 %v1512_v16  ;;  %v1554_v44 = vld [vmem:[#allocation5 + $0x1d0] ss:$8 sps:$4 sm:$0xff]   ;;  %v1558_v45 = vld [vmem:[#allocation5 + $0x1c4] ss:$8 sps:$4 sm:$0xff]   ;;  %v1557_v47 = vld [vmem:[#allocation5 + $0xc0] ss:$8 sps:$4 sm:$0xff]  }
  0x44   :  { %748 = vmatprep.subr.bf16.mxu1 %v1516_v17  ;;  %v82_v46 = vld [vmem:[#allocation2 + $0x8] sm:$0xff]  ;;  %v84_v50 = vld [vmem:[#allocation2 + $0x18] sm:$0xff]  ;;  %v81_v4 = vld [vmem:[#allocation2] sm:$0xff]  ;;  %vm695_vm0 = vcmask 130048  }
  0x45   :  { %v89_v48 = vpack.c.bf16 %v82_v46, %v82_v46  ;;  %v1561_v49 = vld [vmem:[#allocation5 + $0xb4] ss:$8 sps:$4 sm:$0xff]   ;;  %v1560_v51 = vld [vmem:[#allocation5 + $0x1c0] ss:$8 sps:$4 sm:$0xff]   ;;  %v91_v52 = vpack.c.bf16 %v84_v50, %v84_v50  ;;  %v1563_v54 = vld [vmem:[#allocation5 + $0xb0] ss:$8 sps:$4 sm:$0xff]   ;;  %v88_v7 = vpack.c.bf16 %v81_v4, %v81_v4 }
  0x46   :  { %708 = vmatpush1.bf16.msra.mxu0 %v1515_v18  ;;  %v1564_v53 = vld [vmem:[#allocation5 + $0x1b4] ss:$8 sps:$4 sm:$0xff]   ;;  %v1567_v55 = vld [vmem:[#allocation5 + $0xa4] ss:$8 sps:$4 sm:$0xff]   ;;  %v1566_v56 = vld [vmem:[#allocation5 + $0x1b0] ss:$8 sps:$4 sm:$0xff]  }
  0x47   :  { %709 = vmatprep.subr.bf16.mxu0 %v1519_v19  ;;  %749 = vmatpush1.bf16.msra.mxu1 %v1518_v20  ;;  %v1570_v57 = vld [vmem:[#allocation5 + $0x1a4] ss:$8 sps:$4 sm:$0xff]   ;;  %v1569_v58 = vld [vmem:[#allocation5 + $0xa0] ss:$8 sps:$4 sm:$0xff]   ;;  %v1573_v59 = vld [vmem:[#allocation5 + $0x94] ss:$8 sps:$4 sm:$0xff]  }
  0x48   :  { %750 = vmatprep.subr.bf16.mxu1 %v1522_v21  ;;  %731 = vmatprep.mubr.bf16.mxu0 %v89_v48  ;;  %v1572_v60 = vld [vmem:[#allocation5 + $0x1a0] ss:$8 sps:$4 sm:$0xff]   ;;  %v1576_v61 = vld [vmem:[#allocation5 + $0x194] ss:$8 sps:$4 sm:$0xff]   ;;  %v1575_v62 = vld [vmem:[#allocation5 + $0x90] ss:$8 sps:$4 sm:$0xff]  }
  0x49   :  { %772 = vmatprep.mubr.bf16.mxu1 %v91_v52  ;;  %v1579_v63 = vld [vmem:[#allocation5 + $0x84] ss:$8 sps:$4 sm:$0xff]   ;;  %v1578_v0 = vld [vmem:[#allocation5 + $0x190] ss:$8 sps:$4 sm:$0xff]   ;;  %v1581_v1 = vld [vmem:[#allocation5 + $0x80] ss:$8 sps:$4 sm:$0xff]  }
  0x4a   :  { %710 = vmatpush1.bf16.msra.mxu0 %v1521_v22  ;;  %v1582_v2 = vld [vmem:[#allocation5 + $0x184] ss:$8 sps:$4 sm:$0xff]   ;;  %v1584_v3 = vld [vmem:[#allocation5 + $0x180] ss:$8 sps:$4 sm:$0xff]   ;;  %v1587_v5 = vld [vmem:[#allocation5 + $0x274] ss:$8 sps:$4 sm:$0xff]  }
  0x4b   :  { %711 = vmatprep.subr.bf16.mxu0 %v1525_v23  ;;  %751 = vmatpush1.bf16.msra.mxu1 %v1524_v24  ;;  %v83_v6 = vld [vmem:[#allocation2 + $0x10] sm:$0xff]  ;;  %v1590_v9 = vld [vmem:[#allocation5 + $0x264] ss:$8 sps:$4 sm:$0xff]   ;;  %v1630_v11 = vld [vmem:[#allocation5 + $0x300] ss:$8 sps:$4 sm:$0xff]   ;;  %v1816_v19 = vmov 0  }
  0x4c   :  { %752 = vmatprep.subr.bf16.mxu1 %v1528_v25  ;;  %v1585_v8 = vld [vmem:[#allocation5 + $0x270] ss:$8 sps:$4 sm:$0xff]   ;;  %v90_v10 = vpack.c.bf16 %v83_v6, %v83_v6  ;;  %v1632_v12 = vld [vmem:[#allocation5 + $0x304] ss:$8 sps:$4 sm:$0xff]   ;;  %v1588_v13 = vld [vmem:[#allocation5 + $0x260] ss:$8 sps:$4 sm:$0xff]  }
  0x4d   :  { %v1593_v14 = vld [vmem:[#allocation5 + $0x254] ss:$8 sps:$4 sm:$0xff]   ;;  %v1591_v18 = vld [vmem:[#allocation5 + $0x250] ss:$8 sps:$4 sm:$0xff]   ;;  %v1596_v20 = vld [vmem:[#allocation5 + $0x244] ss:$8 sps:$4 sm:$0xff]  }
  0x4e   :  { %712 = vmatpush1.bf16.msra.mxu0 %v1527_v26  ;;  %v87_v15 = vld [vmem:[#allocation2 + $0x30] sm:$0xff]  ;;  %v86_v16 = vld [vmem:[#allocation2 + $0x28] sm:$0xff]  ;;  %v1594_v22 = vld [vmem:[#allocation5 + $0x240] ss:$8 sps:$4 sm:$0xff]  }
  0x4f   :  { %713 = vmatprep.subr.bf16.mxu0 %v1531_v27  ;;  %753 = vmatpush1.bf16.msra.mxu1 %v1530_v28  ;;  %v93_v17 = vpack.c.bf16 %v86_v16, %v86_v16  ;;  %v94_v21 = vpack.c.bf16 %v87_v15, %v87_v15  ;;  %v1599_v23 = vld [vmem:[#allocation5 + $0x234] ss:$8 sps:$4 sm:$0xff]   ;;  %v1597_v24 = vld [vmem:[#allocation5 + $0x230] ss:$8 sps:$4 sm:$0xff]   ;;  %v1602_v25 = vld [vmem:[#allocation5 + $0x224] ss:$8 sps:$4 sm:$0xff]  }
  0x50   :  { %754 = vmatprep.subr.bf16.mxu1 %v1534_v29  ;;  %v1600_v26 = vld [vmem:[#allocation5 + $0x220] ss:$8 sps:$4 sm:$0xff]   ;;  %v1605_v27 = vld [vmem:[#allocation5 + $0x214] ss:$8 sps:$4 sm:$0xff]   ;;  %v1603_v28 = vld [vmem:[#allocation5 + $0x210] ss:$8 sps:$4 sm:$0xff]  }
  0x51   :  { %v1608_v29 = vld [vmem:[#allocation5 + $0x204] ss:$8 sps:$4 sm:$0xff]   ;;  %v1633_v46 = vld [vmem:[#allocation5 + $0x280] ss:$8 sps:$4 sm:$0xff]   ;;  %v1639_v52 = vld [vmem:[#allocation7 + $0x60] ss:$8 sps:$4 sm:$0xff]  }
  0x52   :  { %714 = vmatpush1.bf16.msra.mxu0 %v1533_v30  ;;  %v1606_v30 = vld [vmem:[#allocation5 + $0x200] ss:$8 sps:$4 sm:$0xff]   ;;  %v1638_v50 = vld [vmem:[#allocation7 + $0x74] ss:$8 sps:$4 sm:$0xff]   ;;  %v1663_v4 = vld [vmem:[#allocation7 + $0xe0] ss:$8 sps:$4 sm:$0xff]  }
  0x53   :  { %715 = vmatprep.subr.bf16.mxu0 %v1537_v31  ;;  %755 = vmatpush1.bf16.msra.mxu1 %v1536_v32  ;;  %v1611_v31 = vld [vmem:[#allocation5 + $0x2f4] ss:$8 sps:$4 sm:$0xff]   ;;  %v1609_v32 = vld [vmem:[#allocation5 + $0x2f0] ss:$8 sps:$4 sm:$0xff]   ;;  %v1666_v6 = vld [vmem:[#allocation7 + $0xd0] ss:$8 sps:$4 sm:$0xff]  }
  0x54   :  { %756 = vmatprep.subr.bf16.mxu1 %v1540_v33  ;;  %v1614_v33 = vld [vmem:[#allocation5 + $0x2e4] ss:$8 sps:$4 sm:$0xff]   ;;  %v1683_v15 = vld [vmem:[#allocation7 + $0x84] ss:$8 sps:$4 sm:$0xff]   ;;  %v1681_v16 = vld [vmem:[#allocation7 + $0x80] ss:$8 sps:$4 sm:$0xff]  }
  0x56   :  { %716 = vmatpush2.bf16.msra.mxu0 %v1539_v34  ;;  %v1612_v34 = vld [vmem:[#allocation5 + $0x2e0] ss:$8 sps:$4 sm:$0xff]  }
  0x57   :  { %717 = vmatprep.subr.bf16.mxu0 %v1543_v35  ;;  %757 = vmatpush2.bf16.msra.mxu1 %v1542_v36  ;;  %v1617_v35 = vld [vmem:[#allocation5 + $0x2d4] ss:$8 sps:$4 sm:$0xff]   ;;  %v1615_v36 = vld [vmem:[#allocation5 + $0x2d0] ss:$8 sps:$4 sm:$0xff]  }
  0x58   :  { %758 = vmatprep.subr.bf16.mxu1 %v1546_v37  ;;  %v1620_v37 = vld [vmem:[#allocation5 + $0x2c4] ss:$8 sps:$4 sm:$0xff]  }
  0x5a   :  { %718 = vmatpush2.bf16.msra.mxu0 %v1545_v38  ;;  %v1618_v38 = vld [vmem:[#allocation5 + $0x2c0] ss:$8 sps:$4 sm:$0xff]  }
  0x5b   :  { %719 = vmatprep.subr.bf16.mxu0 %v1549_v39  ;;  %759 = vmatpush2.bf16.msra.mxu1 %v1548_v40  ;;  %v1623_v39 = vld [vmem:[#allocation5 + $0x2b4] ss:$8 sps:$4 sm:$0xff]   ;;  %v1621_v40 = vld [vmem:[#allocation5 + $0x2b0] ss:$8 sps:$4 sm:$0xff]  }
  0x5c   :  { %760 = vmatprep.subr.bf16.mxu1 %v1552_v41  ;;  %v1626_v41 = vld [vmem:[#allocation5 + $0x2a4] ss:$8 sps:$4 sm:$0xff]  }
  0x5e   :  { %720 = vmatpush2.bf16.msra.mxu0 %v1551_v42  ;;  %v1624_v42 = vld [vmem:[#allocation5 + $0x2a0] ss:$8 sps:$4 sm:$0xff]  }
  0x5f   :  { %721 = vmatprep.subr.bf16.mxu0 %v1555_v43  ;;  %761 = vmatpush2.bf16.msra.mxu1 %v1554_v44  ;;  %v1629_v43 = vld [vmem:[#allocation5 + $0x294] ss:$8 sps:$4 sm:$0xff]   ;;  %v1627_v44 = vld [vmem:[#allocation5 + $0x290] ss:$8 sps:$4 sm:$0xff]  }
  0x60   :  { %762 = vmatprep.subr.bf16.mxu1 %v1558_v45  ;;  %v1635_v45 = vld [vmem:[#allocation5 + $0x284] ss:$8 sps:$4 sm:$0xff]  }
  0x62   :  { %722 = vmatpush2.bf16.msra.mxu0 %v1557_v47  ;;  %v85_v47 = vld [vmem:[#allocation2 + $0x20] sm:$0xff] }
  0x63   :  { %723 = vmatprep.subr.bf16.mxu0 %v1561_v49  ;;  %763 = vmatpush2.bf16.msra.mxu1 %v1560_v51  ;;  %v92_v48 = vpack.c.bf16 %v85_v47, %v85_v47  ;;  %v1636_v49 = vld [vmem:[#allocation7 + $0x70] ss:$8 sps:$4 sm:$0xff]   ;;  %v1641_v51 = vld [vmem:[#allocation7 + $0x64] ss:$8 sps:$4 sm:$0xff]  }
  0x64   :  { %764 = vmatprep.subr.bf16.mxu1 %v1564_v53  ;;  %v1644_v53 = vld [vmem:[#allocation7 + $0x54] ss:$8 sps:$4 sm:$0xff]  }
  0x66   :  { %724 = vmatpush2.bf16.msra.mxu0 %v1563_v54  ;;  %v1642_v54 = vld [vmem:[#allocation7 + $0x50] ss:$8 sps:$4 sm:$0xff]  }
  0x67   :  { %725 = vmatprep.subr.bf16.mxu0 %v1567_v55  ;;  %765 = vmatpush2.bf16.msra.mxu1 %v1566_v56  ;;  %v1647_v55 = vld [vmem:[#allocation7 + $0x44] ss:$8 sps:$4 sm:$0xff]   ;;  %v1645_v56 = vld [vmem:[#allocation7 + $0x40] ss:$8 sps:$4 sm:$0xff]  }
  0x68   :  { %766 = vmatprep.subr.bf16.mxu1 %v1570_v57  ;;  %v1650_v57 = vld [vmem:[#allocation7 + $0x34] ss:$8 sps:$4 sm:$0xff]  }
  0x6a   :  { %726 = vmatpush2.bf16.msra.mxu0 %v1569_v58  ;;  %v1648_v58 = vld [vmem:[#allocation7 + $0x30] ss:$8 sps:$4 sm:$0xff]  }
  0x6b   :  { %727 = vmatprep.subr.bf16.mxu0 %v1573_v59  ;;  %767 = vmatpush2.bf16.msra.mxu1 %v1572_v60  ;;  %v1653_v59 = vld [vmem:[#allocation7 + $0x24] ss:$8 sps:$4 sm:$0xff]   ;;  %v1651_v60 = vld [vmem:[#allocation7 + $0x20] ss:$8 sps:$4 sm:$0xff]  }
  0x6c   :  { %768 = vmatprep.subr.bf16.mxu1 %v1576_v61  ;;  %v1656_v61 = vld [vmem:[#allocation7 + $0x14] ss:$8 sps:$4 sm:$0xff]  }
  0x6e   :  { %728 = vmatpush2.bf16.msra.mxu0 %v1575_v62  ;;  %v1654_v62 = vld [vmem:[#allocation7 + $0x10] ss:$8 sps:$4 sm:$0xff]  }
  0x6f   :  { %729 = vmatprep.subr.bf16.mxu0 %v1579_v63  ;;  %769 = vmatpush2.bf16.msra.mxu1 %v1578_v0  ;;  %v1659_v63 = vld [vmem:[#allocation7 + $0x4] ss:$8 sps:$4 sm:$0xff]   ;;  %v1657_v0 = vld [vmem:[#allocation7] ss:$8 sps:$4 sm:$0xff]  }
  0x70   :  { %770 = vmatprep.subr.bf16.mxu1 %v1582_v2  ;;  %v1660_v2 = vld [vmem:[#allocation7 + $0xf0] ss:$8 sps:$4 sm:$0xff]  }
  0x72   :  { %730 = vmatpush2.bf16.msra.mxu0 %v1581_v1  ;;  %v1662_v1 = vld [vmem:[#allocation7 + $0xf4] ss:$8 sps:$4 sm:$0xff]  }
  0x73   :  { %781 = vmatprep.subr.bf16.mxu0 %v1587_v5  ;;  %771 = vmatpush2.bf16.msra.mxu1 %v1584_v3  ;;  %v1665_v3 = vld [vmem:[#allocation7 + $0xe4] ss:$8 sps:$4 sm:$0xff]   ;;  %v1668_v5 = vld [vmem:[#allocation7 + $0xd4] ss:$8 sps:$4 sm:$0xff]  }
  0x74   :  { %836 = vmatprep.subr.bf16.mxu1 %v1632_v12  ;;  %v1675_v12 = vld [vmem:[#allocation7 + $0xa0] ss:$8 sps:$4 sm:$0xff]  }
  0x75   :  { %732 = vmatmul.mubr.bf16.vlgmr.msra.gmra.mxu0 %v88_v7  ;;  %v1671_v7 = vld [vmem:[#allocation7 + $0xc4] ss:$8 sps:$4 sm:$0xff]  }
  0x76   :  { %782 = vmatpush1.bf16.msra.mxu0 %v1585_v8  ;;  %773 = vmatmul.mubr.bf16.vlgmr.msra.gmra.mxu1 %v90_v10  ;;  %v1669_v8 = vld [vmem:[#allocation7 + $0xc0] ss:$8 sps:$4 sm:$0xff]   ;;  %v1672_v10 = vld [vmem:[#allocation7 + $0xb0] ss:$8 sps:$4 sm:$0xff]  }
  0x77   :  { %783 = vmatprep.subr.bf16.mxu0 %v1590_v9  ;;  %837 = vmatpush1.bf16.msra.mxu1 %v1630_v11  ;;  %v1674_v9 = vld [vmem:[#allocation7 + $0xb4] ss:$8 sps:$4 sm:$0xff]   ;;  %v1677_v11 = vld [vmem:[#allocation7 + $0xa4] ss:$8 sps:$4 sm:$0xff]  }
  0x78   :  { %854 = vmatprep.mubr.bf16.mxu1 %v1816_v19  ;;  %813 = vmatprep.mubr.bf16.mxu0 %v93_v17  ;;  %v1684_v17 = vld [vmem:[#allocation8 + $0x78] sm:$0xff]   ;;  %v1686_v19 = vld [vmem:[#allocation8 + $0x70] sm:$0xff]  }
  0x79   :  { %1071 = vmatprep.subr.bf16.mxu1 %v1638_v50 }
  0x7a   :  { %784 = vmatpush1.bf16.msra.mxu0 %v1588_v13  ;;  %v1680_v13 = vld [vmem:[#allocation7 + $0x94] ss:$8 sps:$4 sm:$0xff]  }
  0x7b   :  { %785 = vmatprep.subr.bf16.mxu0 %v1593_v14  ;;  %v1678_v14 = vld [vmem:[#allocation7 + $0x90] ss:$8 sps:$4 sm:$0xff]  }
  0x7e   :  { %786 = vmatpush1.bf16.msra.mxu0 %v1591_v18  ;;  %1407 = vmatmul.mubr.msk.bf16.vlgmr.msra.gmra.mxu1 %vm695_vm0, %v94_v21  ;;  %v1685_v18 = vld [vmem:[#allocation8 + $0x38] sm:$0xff]   ;;  %v1688_v21 = vld [vmem:[#allocation8 + $0x68] sm:$0xff]  }
  0x7f   :  { %787 = vmatprep.subr.bf16.mxu0 %v1596_v20  ;;  %1072 = vmatpush1.bf16.msra.mxu1 %v1636_v49  ;;  %v1687_v20 = vld [vmem:[#allocation8 + $0x30] sm:$0xff]  }
  0x80   :  { %1073 = vmatprep.subr.bf16.mxu1 %v1641_v51 }
  0x82   :  { %788 = vmatpush1.bf16.msra.mxu0 %v1594_v22  ;;  %v1689_v22 = vld [vmem:[#allocation8 + $0x28] sm:$0xff]  }
  0x83   :  { %789 = vmatprep.subr.bf16.mxu0 %v1599_v23  ;;  %1074 = vmatpush1.bf16.msra.mxu1 %v1639_v52  ;;  %v1690_v23 = vld [vmem:[#allocation8 + $0x60] sm:$0xff]  }
  0x84   :  { %1075 = vmatprep.subr.bf16.mxu1 %v1644_v53 }
  0x86   :  { %790 = vmatpush1.bf16.msra.mxu0 %v1597_v24  ;;  %v1691_v24 = vld [vmem:[#allocation8 + $0x20] sm:$0xff]  }
  0x87   :  { %791 = vmatprep.subr.bf16.mxu0 %v1602_v25  ;;  %1076 = vmatpush1.bf16.msra.mxu1 %v1642_v54  ;;  %v1692_v25 = vld [vmem:[#allocation8 + $0x58] sm:$0xff]  }
  0x88   :  { %1077 = vmatprep.subr.bf16.mxu1 %v1647_v55 }
  0x8a   :  { %792 = vmatpush1.bf16.msra.mxu0 %v1600_v26  ;;  %v1693_v26 = vld [vmem:[#allocation8 + $0x18] sm:$0xff]  }
  0x8b   :  { %793 = vmatprep.subr.bf16.mxu0 %v1605_v27  ;;  %1078 = vmatpush1.bf16.msra.mxu1 %v1645_v56  ;;  %v1694_v27 = vld [vmem:[#allocation8 + $0x50] sm:$0xff]  }
  0x8c   :  { %1079 = vmatprep.subr.bf16.mxu1 %v1650_v57 }
  0x8e   :  { %794 = vmatpush1.bf16.msra.mxu0 %v1603_v28  ;;  %v1695_v28 = vld [vmem:[#allocation8 + $0x10] sm:$0xff]  }
  0x8f   :  { %795 = vmatprep.subr.bf16.mxu0 %v1608_v29  ;;  %1080 = vmatpush1.bf16.msra.mxu1 %v1648_v58 }
  0x90   :  { %1081 = vmatprep.subr.bf16.mxu1 %v1653_v59 }
  0x92   :  { %796 = vmatpush1.bf16.msra.mxu0 %v1606_v30 }
  0x93   :  { %797 = vmatprep.subr.bf16.mxu0 %v1611_v31  ;;  %1082 = vmatpush1.bf16.msra.mxu1 %v1651_v60 }
  0x94   :  { %1083 = vmatprep.subr.bf16.mxu1 %v1656_v61 }
  0x96   :  { %798 = vmatpush2.bf16.msra.mxu0 %v1609_v32 }
  0x97   :  { %799 = vmatprep.subr.bf16.mxu0 %v1614_v33  ;;  %1084 = vmatpush1.bf16.msra.mxu1 %v1654_v62 }
  0x98   :  { %1085 = vmatprep.subr.bf16.mxu1 %v1659_v63 }
  0x9a   :  { %800 = vmatpush2.bf16.msra.mxu0 %v1612_v34 }
  0x9b   :  { %801 = vmatprep.subr.bf16.mxu0 %v1617_v35  ;;  %1086 = vmatpush1.bf16.msra.mxu1 %v1657_v0  ;;  %v1696_v0 = vld [vmem:[#allocation8 + $0x48] sm:$0xff]  }
  0x9c   :  { %1087 = vmatprep.subr.bf16.mxu1 %v1662_v1  ;;  %v1697_v1 = vld [vmem:[#allocation8 + $0x8] sm:$0xff]  }
  0x9e   :  { %802 = vmatpush2.bf16.msra.mxu0 %v1615_v36 }
  0x9f   :  { %803 = vmatprep.subr.bf16.mxu0 %v1620_v37  ;;  %1088 = vmatpush2.bf16.msra.mxu1 %v1660_v2  ;;  %v1698_v2 = vld [vmem:[#allocation8 + $0x40] sm:$0xff]  }
  0xa0   :  { %1089 = vmatprep.subr.bf16.mxu1 %v1665_v3  ;;  %v1699_v3 = vld [vmem:[#allocation8] sm:$0xff]  }
  0xa2   :  { %804 = vmatpush2.bf16.msra.mxu0 %v1618_v38 }
  0xa3   :  { %805 = vmatprep.subr.bf16.mxu0 %v1623_v39  ;;  %1090 = vmatpush2.bf16.msra.mxu1 %v1663_v4  ;;  %v899_v4 = vld [vmem:[%s1886_s4] sm:$0x3]  ;;  %s1817_s4 = smov [#allocation10]  }
  0xa4   :  { %1091 = vmatprep.subr.bf16.mxu1 %v1668_v5  ;;  %s1298_s26 = sshll.u32 %s1817_s4, 4  ;;  %s1299_s26 = int_to_ptr.vmem [resolvable:$true] %s1298_s26 }
  0xa5   :  { %s1780_s27 = scalar_lea.vmem %s1299_s26, 128  ;;  %p1785_p7 = scmp.lt.s32.totalorder %s1299_s26, %s1299_s26 }
  0xa6   :  { %806 = vmatpush2.bf16.msra.mxu0 %v1621_v40  ;;  %p1781_p6 = scmp.ne.s32.totalorder %s1299_s26, %s1780_s27  ;;  %p1786_p8 = scmp.lt.s32.totalorder %s1780_s27, %s1780_s27 }
  0xa7   :  { %807 = vmatprep.subr.bf16.mxu0 %v1626_v41  ;;  %1092 = vmatpush2.bf16.msra.mxu1 %v1666_v6  ;;  %v195_v41 = vlaneseq }
  0xa8   :  { %1093 = vmatprep.subr.bf16.mxu1 %v1671_v7  ;;  %p1787_p9 = por %p1786_p8, %p1785_p7 }
  0xaa   :  { %808 = vmatpush2.bf16.msra.mxu0 %v1624_v42  ;;  %v196_v42 = vshrl.u32 %v195_v41, 7  ;;  %p1788_p10 = pnand %p1787_p9, %p1781_p6 }
  0xab   :  { %809 = vmatprep.subr.bf16.mxu0 %v1629_v43  ;;  %1094 = vmatpush2.bf16.msra.mxu1 %v1669_v8 }
  0xac   :  { %1095 = vmatprep.subr.bf16.mxu1 %v1674_v9  ;;  %v197_v43 = vsub.s32 0, %v196_v42 }
  0xae   :  { %810 = vmatpush2.bf16.msra.mxu0 %v1627_v44  ;;  %v193_v44 = vld [vmem:[%s1884_s2] sm:$0x3]  ;;  %v904_v5 = vrot.slane %v899_v4, %v197_v43 }
  0xaf   :  { %811 = vmatprep.subr.bf16.mxu0 %v1635_v45  ;;  %1096 = vmatpush2.bf16.msra.mxu1 %v1672_v10  ;;  %v201_v45 = vsub.s32 1, %v196_v42 }
  0xb0   :  { %1097 = vmatprep.subr.bf16.mxu1 %v1677_v11 }
  0xb1   :  { %v202_v47 = vrot.slane %v193_v44, %v201_v45  ;;  %v908_v6 = vrot.slane %v899_v4, %v201_v45 }
  0xb2   :  { %812 = vmatpush2.bf16.msra.mxu0 %v1633_v46  ;;  %v198_v46 = vrot.slane %v193_v44, %v197_v43 }
  0xb3   :  { %1098 = vmatpush2.bf16.msra.mxu1 %v1675_v12  ;;  %1457 = vmatprep.subr.bf16.mxu0 %v1684_v17 }
  0xb4   :  { %1099 = vmatprep.subr.bf16.mxu1 %v1680_v13 }
  0xb5   :  { %814 = vmatmul.mubr.bf16.vlgmr.msra.gmra.mxu0 %v92_v48 }
  0xb6   :  { %1458 = vmatpush3.bf16.msra.mxu0 %v1685_v18  ;;  %v1440_v18 = vld [vmem:[%s1888_s6] ss:$0 sm:$0xff] }
  0xb7   :  { %1100 = vmatpush2.bf16.msra.mxu1 %v1678_v14  ;;  %1459 = vmatprep.subr.bf16.mxu0 %v1686_v19 }
  0xb8   :  { %1101 = vmatprep.subr.bf16.mxu1 %v1683_v15 }
  0xba   :  { %1460 = vmatpush3.bf16.msra.mxu0 %v1687_v20 }
  0xbb   :  { %1102 = vmatpush2.bf16.msra.mxu1 %v1681_v16  ;;  %1461 = vmatprep.subr.bf16.mxu0 %v1688_v21 }
  0xbe   :  { %1462 = vmatpush3.bf16.msra.mxu0 %v1689_v22 }
  0xbf   :  { %1463 = vmatprep.subr.bf16.mxu0 %v1690_v23 }
  0xc2   :  { %1464 = vmatpush3.bf16.msra.mxu0 %v1691_v24 }
  0xc3   :  { %1465 = vmatprep.subr.bf16.mxu0 %v1692_v25 }
  0xc6   :  { %1466 = vmatpush3.bf16.msra.mxu0 %v1693_v26 }
  0xc7   :  { %1467 = vmatprep.subr.bf16.mxu0 %v1694_v27 }
  0xca   :  { %1468 = vmatpush3.bf16.msra.mxu0 %v1695_v28 }
  0xcb   :  { %1469 = vmatprep.subr.bf16.mxu0 %v1696_v0 }
  0xce   :  { %1470 = vmatpush3.bf16.msra.mxu0 %v1697_v1 }
  0xcf   :  { %1471 = vmatprep.subr.bf16.mxu0 %v1698_v2 }
  0xd2   :  { %1472 = vmatpush3.bf16.msra.mxu0 %v1699_v3 }
 0x135   :  { %v733_v29 = vpop.f32.mrf.mxu0 }
 0x136   :  { %v774_v31 = vpop.f32.mrf.mxu1  ;;  %v734_v48 = vadd.f32 %v733_v29, %v198_v46 }
 0x137   :  { %v735_v30 = vpop.f32.mrf.mxu0 }
 0x138   :  { %v776_v33 = vpop.f32.mrf.mxu1  ;;  %v736_v49 = vadd.f32 %v735_v30, %v202_v47  ;;  %v775_v50 = vadd.f32 %v774_v31, %v734_v48 }
 0x139   :  { %v737_v32 = vpop.f32.mrf.mxu0 }
 0x13a   :  { %v778_v35 = vpop.f32.mrf.mxu1  ;;  %v777_v52 = vadd.f32 %v776_v33, %v736_v49 }
 0x13b   :  { %v738_v34 = vpop.f32.mrf.mxu0 }
 0x13c   :  { %v779_v36 = vpop.f32.mrf.mxu1 }
 0x13e   :  { %v856_v37 = vpop.f32.mrf.mxu1 }
 0x140   :  { %v858_v38 = vpop.f32.mrf.mxu1 }
 0x142   :  { %v860_v39 = vpop.f32.mrf.mxu1 }
 0x144   :  { %v861_v40 = vpop.f32.mrf.mxu1 }
 0x175   :  { %v815_v51 = vpop.f32.mrf.mxu0 }
 0x176   :  { %v816_v53 = vadd.f32 %v815_v51, %v775_v50 }
 0x177   :  { %v817_v54 = vpop.f32.mrf.mxu0 }
 0x178   :  { %v857_v55 = vadd.f32 %v856_v37, %v816_v53  ;;  %v818_v56 = vadd.f32 %v817_v54, %v777_v52 }
 0x179   :  { %v819_v57 = vpop.f32.mrf.mxu0 }
 0x17a   :  { %v859_v58 = vadd.f32 %v858_v38, %v818_v56  ;;  %v863_v59 = vmax.f32 %v857_v55, 0.0 }
 0x17b   :  { %v820_v60 = vpop.f32.mrf.mxu0 }
 0x17c   :  { %v864_v61 = vmax.f32 %v859_v58, 0.0  ;;  %v865_v63 = vpack.c.bf16 %v863_v59, %v863_v59 }
 0x17e   :  { %v866_v62 = vpack.c.bf16 %v864_v61, %v864_v61 }
 0x180   :  { %1103 = vmatprep.mubr.bf16.mxu1 %v866_v62 }
 0x181   :  { %1104 = vmatmul.mubr.bf16.vlgmr.msra.gmra.mxu1 %v865_v63 }
 0x241   :  { %v1105_v7 = vpop.f32.mrf.mxu1 }
 0x242   :  { %v1106_v8 = vadd.f32 %v1105_v7, %v904_v5 }
 0x243   :  { %v1107_v9 = vpop.f32.mrf.mxu1 }
 0x244   :  { %v1108_v10 = vadd.f32 %v1107_v9, %v908_v6  ;;  %v1112_v11 = vmax.f32 %v1106_v8, 0.0 }
 0x245   :  { %v1109_v12 = vpop.f32.mrf.mxu1 }
 0x246   :  { %v1113_v13 = vmax.f32 %v1108_v10, 0.0  ;;  %v1114_v16 = vpack.c.bf16 %v1112_v11, %v1112_v11 }
 0x247   :  { %v1110_v14 = vpop.f32.mrf.mxu1 }
 0x248   :  { %v1115_v15 = vpack.c.bf16 %v1113_v13, %v1113_v13 }
 0x24a   :  { %1283 = vmatprep.mubr.bf16.mxu0 %v1115_v15 }
 0x24b   :  { %1284 = vmatmul.mubr.bf16.vlgmr.msra.gmra.mxu0 %v1114_v16 }
 0x30b   :  { %v1473_v17 = vpop.f32.mrf.mxu0 }
 0x30d   :  { %v1474_v19 = vpop.f32.mrf.mxu0 }
 0x30e   :  { %v1475_v20 = vadd.f32 %v1474_v19, %v1473_v17 }
 0x30f   :  { %v1476_v21 = vpop.f32.mrf.mxu0 }
 0x310   :  { %v1286_v22 = vadd.f32 %v1475_v20, %v1440_v18 }
 0x311   :  { %v1477_v23 = vpop.f32.mrf.mxu0 }
 0x312   :  { %1291 = vst [vmem:[#allocation10] sm:$0xff] %v1286_v22 }
 0x313   :  { %1791 = shalt.err (!%p1788_p10)
}
 0x314   :  { %1301 = dma.vmem_to_hbm [thread:$0]  %s1299_s26, 128, %s1889_s7, [#allocation4]  }
 0x315   :  { %1806 = dma.done.wait [#allocation4], 128  }
 0x316   :  { %1807 = vsyncadd [#allocation4], 4294967168 }
 0x317   :  { %1305 = vsyncpa [#allocation3], 1 }
 0x318   :  { %1306 = vsyncpa [#allocation6], 1 }
 0x319   :  { %1307 = vsyncpa [#allocation9], 1 }
 0x31a   :  { %1308 = vsyncpa [#allocation4], 1 }

</bundles_post_ra>
